<compile_context>
chip_gen: v6e
topology: v6e:2x2x1
jax: 0.10.0
libtpu: 0.0.40
codegen_flags: <defaults>
</compile_context>

<pallas_src>
import functools

import jax
import jax.numpy as jnp
from jax import lax
from jax.experimental import pallas as pl
from jax.experimental.pallas import tpu as pltpu

N_INPUT = 8   # elec2 dataset has 8 features
H1, H2, H3, N_OUT = 100, 100, 10, 2


def _mlp_kernel(x_ref,
                w1_ref, b1_ref,
                w2_ref, b2_ref,
                w3_ref, b3_ref,
                w4_ref, b4_ref,
                o_ref):
    # x tile: (tile_b, N_INPUT) f32 streamed from HBM; cast to bf16 in-kernel
    # (VPU has plenty of slack) right before the MXU.
    x = x_ref[...].astype(jnp.bfloat16)

    # Layer 1, feature-major: (H1, N_IN) contracted with x's feature axis
    # (trans-B dot, the same pattern as q @ k.T) -> (H1, tile_b), lane-dense.
    h = lax.dot_general(w1_ref[...], x, (((1,), (1,)), ((), ())),
                        preferred_element_type=jnp.float32)
    h = jnp.maximum(h + b1_ref[...], 0.0)

    # Layer 2: (H2, H1) @ (H1, tile_b) -> (H2, tile_b)
    h = jnp.dot(w2_ref[...], h.astype(jnp.bfloat16),
                preferred_element_type=jnp.float32)
    h = jnp.maximum(h + b2_ref[...], 0.0)

    # Layer 3: (H3, H2) @ (H2, tile_b) -> (H3, tile_b)
    h = jnp.dot(w3_ref[...], h.astype(jnp.bfloat16),
                preferred_element_type=jnp.float32)
    h = jnp.maximum(h + b3_ref[...], 0.0)

    # Layer 4 (no ReLU): (N_OUT, H3) @ (H3, tile_b) -> (N_OUT, tile_b)
    h = jnp.dot(w4_ref[...], h.astype(jnp.bfloat16),
                preferred_element_type=jnp.float32)
    o_ref[...] = (h + b4_ref[...]).astype(o_ref.dtype)


def _round_up(n, m):
    return ((n + m - 1) // m) * m


def _choose_tile_b(B, tile_b):
    """Pick a batch tile: lane-dense multi-block tiles, >=2 steps for megacore."""
    # v7x megacore: if the batch is big enough to split into two 128-aligned
    # tiles, cap the tile so the grid has at least 2 steps to shard across the
    # two TensorCores (no-op cost on v5e/v6e: ~0.35 us extra per step).
    if B >= 2 * 128:
        tile_b = min(tile_b, _round_up(pl.cdiv(B, 2), 128))
    if tile_b >= B:
        return B                              # single full-array block: always legal
    return max(128, (tile_b // 128) * 128)    # multi-block: multiple of 128 lanes


@functools.partial(jax.jit, static_argnames=("tile_b",))
def net_forward(x, kparams, tile_b=2048):
    """x: (B, N_INPUT) float32. kparams: prepared params (see prepare_params).

    Returns (B, N_OUT) float32, matching the PyTorch module's forward.
    """
    B = x.shape[0]
    tb = _choose_tile_b(B, tile_b)
    grid = (pl.cdiv(B, tb),)

    def pinned(shape):
        # Full-array block, same block index every grid step -> VMEM-resident.
        return pl.BlockSpec(shape, lambda i: (0, 0))

    in_specs = [
        pl.BlockSpec((tb, N_INPUT), lambda i: (i, 0)),   # streamed f32 x tile
        pinned((H1, N_INPUT)), pinned((H1, 1)),
        pinned((H2, H1)),      pinned((H2, 1)),
        pinned((H3, H2)),      pinned((H3, 1)),
        pinned((N_OUT, H3)),   pinned((N_OUT, 1)),
    ]
    # Lane-dense output: (N_OUT, tile_b) block of a (N_OUT, B) array.
    out_specs = pl.BlockSpec((N_OUT, tb), lambda i: (0, i))

    # Advisory cost for XLA's scheduler.
    n_mac = N_INPUT * H1 + H1 * H2 + H2 * H3 + H3 * N_OUT
    param_bytes = 2 * n_mac + 4 * (H1 + H2 + H3 + N_OUT)
    cost = pl.CostEstimate(
        flops=2 * B * n_mac,
        transcendentals=0,
        bytes_accessed=B * (N_INPUT * 4 + N_OUT * 4) + param_bytes,
    )

    out_t = pl.pallas_call(
        _mlp_kernel,
        out_shape=jax.ShapeDtypeStruct((N_OUT, B), jnp.float32),
        grid=grid,
        in_specs=in_specs,
        out_specs=out_specs,
        compiler_params=pltpu.CompilerParams(
            dimension_semantics=("parallel",),       # megacore sharding on v7x
            vmem_limit_bytes=32 * 1024 * 1024,       # explicit headroom, fits all gens
        ),
        cost_estimate=cost,
    )(x,
      kparams["w1"], kparams["b1"],
      kparams["w2"], kparams["b2"],
      kparams["w3"], kparams["b3"],
      kparams["w4"], kparams["b4"])

    # Layout plumbing only: transpose the tiny (N_OUT, B) result back to (B, N_OUT).
    return out_t.T


def init_params(key):
    """Deterministic init mimicking torch.nn.Linear defaults.

    Weights use the native PyTorch layout (out_features, in_features), biases
    are (out_features,), both f32 — this is the 'reference' parameter set.
    """
    dims = [(H1, N_INPUT), (H2, H1), (H3, H2), (N_OUT, H3)]
    params = {}
    for i, (fan_out, fan_in) in enumerate(dims, start=1):
        key, kw, kb = jax.random.split(key, 3)
        bound = 1.0 / (float(fan_in) ** 0.5)
        params[f"w{i}"] = jax.random.uniform(
            kw, (fan_out, fan_in), jnp.float32, minval=-bound, maxval=bound)
        params[f"b{i}"] = jax.random.uniform(
            kb, (fan_out,), jnp.float32, minval=-bound, maxval=bound)
    return params


def prepare_params(params):
    """One-time (outside jit) conversion to kernel layout: bf16 weights in
    (out, in) layout, f32 biases as (out, 1) columns for lane-broadcast."""
    kp = {}
    for i in range(1, 5):
        kp[f"w{i}"] = params[f"w{i}"].astype(jnp.bfloat16)
        kp[f"b{i}"] = params[f"b{i}"].reshape(-1, 1).astype(jnp.float32)
    return kp


def _reference_forward(x, params):
    """Pure-f32 JAX reference of the original PyTorch forward pass."""
    h = jnp.maximum(x @ params["w1"].T + params["b1"], 0.0)
    h = jnp.maximum(h @ params["w2"].T + params["b2"], 0.0)
    h = jnp.maximum(h @ params["w3"].T + params["b3"], 0.0)
    return h @ params["w4"].T + params["b4"]


if __name__ == "__main__":
    key = jax.random.PRNGKey(0)
    key, kx = jax.random.split(key)
    params = init_params(key)
    kparams = prepare_params(params)   # single bf16 cast, outside the jitted forward

    # Small smoke test (single full-array block).
    batch = 8
    x = jax.random.normal(kx, (batch, N_INPUT), dtype=jnp.float32)
    out = jax.block_until_ready(net_forward(x, kparams))
    ref = _reference_forward(x, params)
    assert out.shape == (batch, N_OUT)
    # bf16 matmul inputs -> loosened tolerance vs the f32 reference.
    assert jnp.allclose(out, ref, atol=3e-2, rtol=3e-2), "mismatch vs reference (batch=8)"

    # Multi-tile path with a partial trailing tile (grid=2, masked writeback).
    key, kx2 = jax.random.split(key)
    batch2 = 200
    x2 = jax.random.normal(kx2, (batch2, N_INPUT), dtype=jnp.float32)
    out2 = jax.block_until_ready(net_forward(x2, kparams, tile_b=128))
    ref2 = _reference_forward(x2, params)
    assert out2.shape == (batch2, N_OUT)
    assert jnp.allclose(out2, ref2, atol=3e-2, rtol=3e-2), "mismatch vs reference (batch=200)"

    # Default-tile path that triggers the >=2-step megacore split (tile=256, grid=2).
    key, kx3 = jax.random.split(key)
    batch3 = 384
    x3 = jax.random.normal(kx3, (batch3, N_INPUT), dtype=jnp.float32)
    out3 = jax.block_until_ready(net_forward(x3, kparams))
    ref3 = _reference_forward(x3, params)
    assert out3.shape == (batch3, N_OUT)
    assert jnp.allclose(out3, ref3, atol=3e-2, rtol=3e-2), "mismatch vs reference (batch=384)"

    print("KERNEL_OK")
</pallas_src>

<mosaic_0001>
module attributes {stable_mosaic.version = 11 : i64} {
  func.func @_mlp_kernel(%arg0: i32, %arg1: memref<8x8xf32, #tpu.memory_space<vmem>>, %arg2: memref<100x8xbf16, #tpu.memory_space<vmem>>, %arg3: memref<100x1xf32, #tpu.memory_space<vmem>>, %arg4: memref<100x100xbf16, #tpu.memory_space<vmem>>, %arg5: memref<100x1xf32, #tpu.memory_space<vmem>>, %arg6: memref<10x100xbf16, #tpu.memory_space<vmem>>, %arg7: memref<10x1xf32, #tpu.memory_space<vmem>>, %arg8: memref<2x10xbf16, #tpu.memory_space<vmem>>, %arg9: memref<2x1xf32, #tpu.memory_space<vmem>>, %arg10: memref<2x8xf32, #tpu.memory_space<vmem>>) attributes {dimension_semantics = [#tpu.dimension_semantics<parallel>], iteration_bounds = array<i64: 1>, scalar_prefetch = 0 : i64, scratch_operands = 0 : i64, tpu.core_type = #tpu.core_type<tc>, window_params = [{transform_indices = @transform_0, window_bounds = array<i64: 8, 8>}, {pipeline_mode = #tpu.pipeline_mode<synchronous>, transform_indices = @transform_1, window_bounds = array<i64: 100, 8>}, {pipeline_mode = #tpu.pipeline_mode<synchronous>, transform_indices = @transform_2, window_bounds = array<i64: 100, 1>}, {pipeline_mode = #tpu.pipeline_mode<synchronous>, transform_indices = @transform_3, window_bounds = array<i64: 100, 100>}, {pipeline_mode = #tpu.pipeline_mode<synchronous>, transform_indices = @transform_4, window_bounds = array<i64: 100, 1>}, {pipeline_mode = #tpu.pipeline_mode<synchronous>, transform_indices = @transform_5, window_bounds = array<i64: 10, 100>}, {pipeline_mode = #tpu.pipeline_mode<synchronous>, transform_indices = @transform_6, window_bounds = array<i64: 10, 1>}, {pipeline_mode = #tpu.pipeline_mode<synchronous>, transform_indices = @transform_7, window_bounds = array<i64: 2, 10>}, {pipeline_mode = #tpu.pipeline_mode<synchronous>, transform_indices = @transform_8, window_bounds = array<i64: 2, 1>}, {transform_indices = @transform_9, window_bounds = array<i64: 2, 8>}]} {
    %c0 = arith.constant 0 : index
    %c0_0 = arith.constant 0 : index
    %0 = vector.load %arg1[%c0, %c0_0] : memref<8x8xf32, #tpu.memory_space<vmem>>, vector<8x8xf32>
    %1 = arith.truncf %0 : vector<8x8xf32> to vector<8x8xbf16>
    %c0_1 = arith.constant 0 : index
    %c0_2 = arith.constant 0 : index
    %2 = vector.load %arg2[%c0_1, %c0_2] : memref<100x8xbf16, #tpu.memory_space<vmem>>, vector<100x8xbf16>
    %cst = arith.constant dense<0.000000e+00> : vector<100x8xf32>
    %3 = tpu.matmul %2, %1, %cst {dimension_numbers = #tpu.dot_dimension_numbers<[1], [1], [0], [0], [0, 0, 1, 0], [], []>} : vector<100x8xbf16>, vector<8x8xbf16>, vector<100x8xf32> -> vector<100x8xf32>
    %c0_3 = arith.constant 0 : index
    %c0_4 = arith.constant 0 : index
    %4 = vector.load %arg3[%c0_3, %c0_4] : memref<100x1xf32, #tpu.memory_space<vmem>>, vector<100x1xf32>
    %5 = vector.broadcast %4 : vector<100x1xf32> to vector<100x8xf32>
    %6 = arith.addf %3, %5 : vector<100x8xf32>
    %cst_5 = arith.constant 0.000000e+00 : f32
    %7 = vector.broadcast %cst_5 : f32 to vector<100x8xf32>
    %8 = arith.maximumf %6, %7 : vector<100x8xf32>
    %c0_6 = arith.constant 0 : index
    %c0_7 = arith.constant 0 : index
    %9 = vector.load %arg4[%c0_6, %c0_7] : memref<100x100xbf16, #tpu.memory_space<vmem>>, vector<100x100xbf16>
    %10 = arith.truncf %8 : vector<100x8xf32> to vector<100x8xbf16>
    %cst_8 = arith.constant dense<0.000000e+00> : vector<100x8xf32>
    %11 = tpu.matmul %9, %10, %cst_8 {dimension_numbers = #tpu.dot_dimension_numbers<[1], [0], [0], [1], [0, 0, 1, 1], [], []>} : vector<100x100xbf16>, vector<100x8xbf16>, vector<100x8xf32> -> vector<100x8xf32>
    %c0_9 = arith.constant 0 : index
    %c0_10 = arith.constant 0 : index
    %12 = vector.load %arg5[%c0_9, %c0_10] : memref<100x1xf32, #tpu.memory_space<vmem>>, vector<100x1xf32>
    %13 = vector.broadcast %12 : vector<100x1xf32> to vector<100x8xf32>
    %14 = arith.addf %11, %13 : vector<100x8xf32>
    %cst_11 = arith.constant 0.000000e+00 : f32
    %15 = vector.broadcast %cst_11 : f32 to vector<100x8xf32>
    %16 = arith.maximumf %14, %15 : vector<100x8xf32>
    %c0_12 = arith.constant 0 : index
    %c0_13 = arith.constant 0 : index
    %17 = vector.load %arg6[%c0_12, %c0_13] : memref<10x100xbf16, #tpu.memory_space<vmem>>, vector<10x100xbf16>
    %18 = arith.truncf %16 : vector<100x8xf32> to vector<100x8xbf16>
    %cst_14 = arith.constant dense<0.000000e+00> : vector<10x8xf32>
    %19 = tpu.matmul %17, %18, %cst_14 {dimension_numbers = #tpu.dot_dimension_numbers<[1], [0], [0], [1], [0, 0, 1, 1], [], []>} : vector<10x100xbf16>, vector<100x8xbf16>, vector<10x8xf32> -> vector<10x8xf32>
    %c0_15 = arith.constant 0 : index
    %c0_16 = arith.constant 0 : index
    %20 = vector.load %arg7[%c0_15, %c0_16] : memref<10x1xf32, #tpu.memory_space<vmem>>, vector<10x1xf32>
    %21 = vector.broadcast %20 : vector<10x1xf32> to vector<10x8xf32>
    %22 = arith.addf %19, %21 : vector<10x8xf32>
    %cst_17 = arith.constant 0.000000e+00 : f32
    %23 = vector.broadcast %cst_17 : f32 to vector<10x8xf32>
    %24 = arith.maximumf %22, %23 : vector<10x8xf32>
    %c0_18 = arith.constant 0 : index
    %c0_19 = arith.constant 0 : index
    %25 = vector.load %arg8[%c0_18, %c0_19] : memref<2x10xbf16, #tpu.memory_space<vmem>>, vector<2x10xbf16>
    %26 = arith.truncf %24 : vector<10x8xf32> to vector<10x8xbf16>
    %cst_20 = arith.constant dense<0.000000e+00> : vector<2x8xf32>
    %27 = tpu.matmul %25, %26, %cst_20 {dimension_numbers = #tpu.dot_dimension_numbers<[1], [0], [0], [1], [0, 0, 1, 1], [], []>} : vector<2x10xbf16>, vector<10x8xbf16>, vector<2x8xf32> -> vector<2x8xf32>
    %c0_21 = arith.constant 0 : index
    %c0_22 = arith.constant 0 : index
    %28 = vector.load %arg9[%c0_21, %c0_22] : memref<2x1xf32, #tpu.memory_space<vmem>>, vector<2x1xf32>
    %29 = vector.broadcast %28 : vector<2x1xf32> to vector<2x8xf32>
    %30 = arith.addf %27, %29 : vector<2x8xf32>
    %c0_23 = arith.constant 0 : index
    %c0_24 = arith.constant 0 : index
    %31 = vector.load %arg10[%c0_23, %c0_24] : memref<2x8xf32, #tpu.memory_space<vmem>>, vector<2x8xf32>
    tpu.vector_store %arg10[%c0_23, %c0_24], %30 {strides = array<i32>} : memref<2x8xf32, #tpu.memory_space<vmem>>, vector<2x8xf32>,
    return
  }
  func.func @transform_0(%arg0: i32) -> (i32, i32) {
    %c0_i32 = arith.constant 0 : i32
    %c0_i32_0 = arith.constant 0 : i32
    return %arg0, %c0_i32 : i32, i32
  }
  func.func @transform_1(%arg0: i32) -> (i32, i32) {
    %c0_i32 = arith.constant 0 : i32
    %c0_i32_0 = arith.constant 0 : i32
    %c0_i32_1 = arith.constant 0 : i32
    return %c0_i32, %c0_i32_0 : i32, i32
  }
  func.func @transform_2(%arg0: i32) -> (i32, i32) {
    %c0_i32 = arith.constant 0 : i32
    %c0_i32_0 = arith.constant 0 : i32
    %c0_i32_1 = arith.constant 0 : i32
    return %c0_i32, %c0_i32_0 : i32, i32
  }
  func.func @transform_3(%arg0: i32) -> (i32, i32) {
    %c0_i32 = arith.constant 0 : i32
    %c0_i32_0 = arith.constant 0 : i32
    %c0_i32_1 = arith.constant 0 : i32
    return %c0_i32, %c0_i32_0 : i32, i32
  }
  func.func @transform_4(%arg0: i32) -> (i32, i32) {
    %c0_i32 = arith.constant 0 : i32
    %c0_i32_0 = arith.constant 0 : i32
    %c0_i32_1 = arith.constant 0 : i32
    return %c0_i32, %c0_i32_0 : i32, i32
  }
  func.func @transform_5(%arg0: i32) -> (i32, i32) {
    %c0_i32 = arith.constant 0 : i32
    %c0_i32_0 = arith.constant 0 : i32
    %c0_i32_1 = arith.constant 0 : i32
    return %c0_i32, %c0_i32_0 : i32, i32
  }
  func.func @transform_6(%arg0: i32) -> (i32, i32) {
    %c0_i32 = arith.constant 0 : i32
    %c0_i32_0 = arith.constant 0 : i32
    %c0_i32_1 = arith.constant 0 : i32
    return %c0_i32, %c0_i32_0 : i32, i32
  }
  func.func @transform_7(%arg0: i32) -> (i32, i32) {
    %c0_i32 = arith.constant 0 : i32
    %c0_i32_0 = arith.constant 0 : i32
    %c0_i32_1 = arith.constant 0 : i32
    return %c0_i32, %c0_i32_0 : i32, i32
  }
  func.func @transform_8(%arg0: i32) -> (i32, i32) {
    %c0_i32 = arith.constant 0 : i32
    %c0_i32_0 = arith.constant 0 : i32
    %c0_i32_1 = arith.constant 0 : i32
    return %c0_i32, %c0_i32_0 : i32, i32
  }
  func.func @transform_9(%arg0: i32) -> (i32, i32) {
    %c0_i32 = arith.constant 0 : i32
    %c0_i32_0 = arith.constant 0 : i32
    return %c0_i32, %arg0 : i32, i32
  }
}

</mosaic_0001>

<bundles_post_ra>
// kernel: net_forward.1
= control target key start
LH: loop header
LB: loop body
LE: loop exit
PB: predicated region body
PF: predicated region fallthrough
CT: control target
= control target key end

     0   :  { %vm160_vm0 = vcmask 64512   ;;  %v893_v1 = vmov 0.0   ;;  %vm894_vm1 = vmmov 0   ;;  %v895_v3 = vmov 0   ;;  %s1169_s0 = inlined_call_operand.vmem [shape: f32[8,8], index: 0, kind: input, shape index: {}]   ;;  %s1170_s1 = inlined_call_operand.vmem [shape: bf16[100,8], index: 1, kind: input, shape index: {}]   ;;  %s1171_s2 = inlined_call_operand.vmem [shape: f32[100,1], index: 2, kind: input, shape index: {}]   ;;  %s1172_s3 = inlined_call_operand.vmem [shape: bf16[100,100], index: 3, kind: input, shape index: {}]   ;;  %s1173_s4 = inlined_call_operand.vmem [shape: f32[100,1], index: 4, kind: input, shape index: {}]   ;;  %s1174_s5 = inlined_call_operand.vmem [shape: bf16[10,100], index: 5, kind: input, shape index: {}]   ;;  %s1175_s6 = inlined_call_operand.vmem [shape: f32[10,1], index: 6, kind: input, shape index: {}]   ;;  %s1176_s7 = inlined_call_operand.vmem [shape: bf16[2,10], index: 7, kind: input, shape index: {}]   ;;  %s1177_s8 = inlined_call_operand.vmem [shape: f32[2,1], index: 8, kind: input, shape index: {}]   ;;  %s1178_s9 = inlined_call_operand.hbm [shape: f32[2,8], index: 9, kind: output, shape index: {}]  }
   0x1   :  { %v34_v0 = vld [vmem:[%s1169_s0] sm:$0xff]  ;;  %754 = vmatprep.subr.bf16.mxu0 %v893_v1  ;;  %756 = vmatprep.mubr.msk.bf16.mxu0 %vm894_vm1, %v893_v1  ;;  %v60_v7 = vld [vmem:[%s1171_s2 + $0x58] sm:$0xff]  ;;  %v59_v8 = vld [vmem:[%s1171_s2 + $0x50] sm:$0xff] }
   0x2   :  { %v35_v2 = vpack.c.bf16 %v34_v0, %v34_v0  ;;  %855 = vset.pattern.permute.xlu1 %v895_v3  ;;  %854 = vset.pattern.permute.xlu0 %v895_v3  ;;  %v856_v5 = vld [vmem:[%s1170_s1] sm:$0xff]   ;;  %v58_v10 = vld [vmem:[%s1171_s2 + $0x48] sm:$0xff]  ;;  %v55_v11 = vld [vmem:[%s1171_s2 + $0x30] sm:$0xff] }
   0x3   :  { %784 = vmatprep.subr.bf16.mxu1 %v893_v1  ;;  %798 = vmatprep.mubr.msk.bf16.mxu1 %vm894_vm1, %v893_v1  ;;  %v61_v6 = vld [vmem:[%s1171_s2 + $0x60] sm:$0xf]  ;;  %v857_v12 = vld [vmem:[%s1170_s1 + $0x8] sm:$0xff]   ;;  %v56_v13 = vld [vmem:[%s1171_s2 + $0x38] sm:$0xff] }
   0x4   :  { %v183_v4 = vsel %vm160_vm0, %v35_v2, 0  ;;  %124 = vperm.xlu0 %854, %v61_v6   ;;  %119 = vperm.xlu1 %855, %v60_v7   ;;  %v57_v9 = vld [vmem:[%s1171_s2 + $0x40] sm:$0xff]  ;;  %v54_v15 = vld [vmem:[%s1171_s2 + $0x28] sm:$0xff]  ;;  %v51_v16 = vld [vmem:[%s1171_s2 + $0x10] sm:$0xff] }
   0x5   :  { %755 = vmatpush3.bf16.xpose.msra.mxu0 %v183_v4  ;;  %v53_v14 = vld [vmem:[%s1171_s2 + $0x20] sm:$0xff] }
   0x6   :  { %826 = vmatprep.subr.bf16.mxu0 %v893_v1 }
   0x8   :  { %114 = vperm.xlu0 %854, %v59_v8   ;;  %104 = vperm.xlu1 %855, %v57_v9  }
   0xc   :  { %757 = vmatmul.mubr.msk.bf16.vlgmr.msra.gmra.mxu0 %vm160_vm0, %v856_v5  ;;  %109 = vperm.xlu0 %854, %v58_v10  }
   0xd   :  { %760 = vmatprep.mubr.msk.bf16.mxu0 %vm894_vm1, %v893_v1  ;;  %94 = vperm.xlu1 %855, %v55_v11  }
  0x10   :  { %99 = vperm.xlu0 %854, %v56_v13  }
  0x11   :  { %84 = vperm.xlu1 %855, %v53_v14  }
  0x14   :  { %761 = vmatmul.mubr.msk.bf16.gmra.mxu0 %vm160_vm0, %v857_v12 }
  0x15   :  { %764 = vmatprep.mubr.msk.bf16.mxu0 %vm894_vm1, %v893_v1 }
  0x16   :  { %14 = vsyncpa [#allocation3], 0  ;;  %v858_v17 = vld [vmem:[%s1170_s1 + $0x10] sm:$0xff]   ;;  %89 = vperm.xlu0 %854, %v54_v15   ;;  %74 = vperm.xlu1 %855, %v51_v16   ;;  %v52_v18 = vld [vmem:[%s1171_s2 + $0x18] sm:$0xff]  ;;  %vm439_vm2 = vcmask 1041408   ;;  %vm417_vm3 = vcmask 818176  }
  0x17   :  { %v49_v19 = vld [vmem:[%s1171_s2] sm:$0xff]  ;;  %v50_v20 = vld [vmem:[%s1171_s2 + $0x8] sm:$0xff]  ;;  %v859_v22 = vld [vmem:[%s1170_s1 + $0x18] sm:$0xff]   ;;  %vm631_vm4 = vcmask 1044480   ;;  %vm627_vm5 = vcmask 80896   ;;  %s896_s26 = smov [#allocation2]  }
  0x18   :  { %v318_v21 = vld [vmem:[%s1173_s4 + $0x60] sm:$0xf]  ;;  %v316_v23 = vld [vmem:[%s1173_s4 + $0x50] sm:$0xff]  ;;  %v317_v24 = vld [vmem:[%s1173_s4 + $0x58] sm:$0xff]  ;;  %s683_s27 = sshll.u32 %s896_s26, 4  ;;  %vm675_vm6 = vcmask 58368   ;;  %s684_s27 = int_to_ptr.vmem [resolvable:$true] %s683_s27 }
  0x19   :  { %v314_v25 = vld [vmem:[%s1173_s4 + $0x40] sm:$0xff]  ;;  %v315_v26 = vld [vmem:[%s1173_s4 + $0x48] sm:$0xff]  ;;  %v312_v28 = vld [vmem:[%s1173_s4 + $0x30] sm:$0xff]  ;;  %s871_s2 = scalar_lea.vmem %s684_s27, 32  ;;  %p876_p1 = scmp.lt.s32.totalorder %s684_s27, %s684_s27 }
  0x1a   :  { %79 = vperm.xlu0 %854, %v52_v18   ;;  %64 = vperm.xlu1 %855, %v49_v19   ;;  %v860_v27 = vld [vmem:[%s1170_s1 + $0x20] sm:$0xff]   ;;  %v313_v29 = vld [vmem:[%s1173_s4 + $0x38] sm:$0xff]  ;;  %v311_v31 = vld [vmem:[%s1173_s4 + $0x28] sm:$0xff]  ;;  %p872_p0 = scmp.ne.s32.totalorder %s684_s27, %s871_s2  ;;  %p877_p2 = scmp.lt.s32.totalorder %s871_s2, %s871_s2 }
  0x1b   :  { %v310_v30 = vld [vmem:[%s1173_s4 + $0x20] sm:$0xff]  ;;  %v861_v32 = vld [vmem:[%s1170_s1 + $0x28] sm:$0xff]   ;;  %v308_v33 = vld [vmem:[%s1173_s4 + $0x10] sm:$0xff] }
  0x1c   :  { %765 = vmatmul.mubr.msk.bf16.gmra.mxu0 %vm160_vm0, %v858_v17  ;;  %v309_v34 = vld [vmem:[%s1173_s4 + $0x18] sm:$0xff]  ;;  %v306_v35 = vld [vmem:[%s1173_s4] sm:$0xff]  ;;  %v307_v36 = vld [vmem:[%s1173_s4 + $0x8] sm:$0xff]  ;;  %p878_p3 = por %p877_p2, %p876_p1 }
  0x1d   :  { %768 = vmatprep.mubr.msk.bf16.mxu0 %vm894_vm1, %v893_v1  ;;  %v862_v37 = vld [vmem:[%s1170_s1 + $0x30] ss:$0 sps:$4 sm:$0x33]   ;;  %v553_v38 = vld [vmem:[%s1175_s6] sm:$0xff]  ;;  %v554_v39 = vld [vmem:[%s1175_s6 + $0x8] sm:$0x3] }
  0x1e   :  { %69 = vperm.xlu0 %854, %v50_v20   ;;  %381 = vperm.xlu1 %855, %v318_v21   ;;  %v621_v40 = vld [vmem:[%s1177_s8] sm:$0x3]  ;;  %p879_p4 = pnand %p878_p3, %p872_p0 }
  0x22   :  { %371 = vperm.xlu0 %854, %v316_v23   ;;  %376 = vperm.xlu1 %855, %v317_v24  }
  0x24   :  { %769 = vmatmul.mubr.msk.bf16.gmra.mxu0 %vm160_vm0, %v859_v22 }
  0x25   :  { %772 = vmatprep.mubr.msk.bf16.mxu0 %vm894_vm1, %v893_v1 }
  0x26   :  { %361 = vperm.xlu0 %854, %v314_v25   ;;  %366 = vperm.xlu1 %855, %v315_v26  }
  0x2a   :  { %351 = vperm.xlu0 %854, %v312_v28   ;;  %356 = vperm.xlu1 %855, %v313_v29  }
  0x2c   :  { %773 = vmatmul.mubr.msk.bf16.gmra.mxu0 %vm160_vm0, %v860_v27 }
  0x2d   :  { %776 = vmatprep.mubr.msk.bf16.mxu0 %vm894_vm1, %v893_v1 }
  0x2e   :  { %341 = vperm.xlu0 %854, %v310_v30   ;;  %346 = vperm.xlu1 %855, %v311_v31  }
  0x32   :  { %331 = vperm.xlu0 %854, %v308_v33   ;;  %336 = vperm.xlu1 %855, %v309_v34  }
  0x34   :  { %777 = vmatmul.mubr.msk.bf16.gmra.mxu0 %vm160_vm0, %v861_v32 }
  0x35   :  { %780 = vmatprep.mubr.msk.bf16.mxu0 %vm894_vm1, %v893_v1 }
  0x36   :  { %321 = vperm.xlu0 %854, %v306_v35   ;;  %326 = vperm.xlu1 %855, %v307_v36  }
  0x3a   :  { %557 = vperm.xlu0 %854, %v553_v38   ;;  %562 = vperm.xlu1 %855, %v554_v39  }
  0x3c   :  { %781 = vmatmul.mubr.msk.bf16.gmra.mxu0 %vm160_vm0, %v862_v37 }
  0x3d   :  { %840 = vmatprep.mubr.msk.bf16.mxu0 %vm894_vm1, %v893_v1 }
  0x3e   :  { %624 = vperm.xlu0 %854, %v621_v40  }
  0x7f   :  { %v125_v41 = vpop.permute.xlu0 %124  ;;  %v120_v42 = vpop.permute.xlu1 %119 }
  0x83   :  { %v115_v43 = vpop.permute.xlu0 %114  ;;  %v105_v44 = vpop.permute.xlu1 %104 }
  0x87   :  { %v110_v45 = vpop.permute.xlu0 %109 }
  0x88   :  { %v95_v46 = vpop.permute.xlu1 %94 }
  0x8b   :  { %v100_v47 = vpop.permute.xlu0 %99 }
  0x8c   :  { %v85_v48 = vpop.permute.xlu1 %84 }
  0x91   :  { %v90_v49 = vpop.permute.xlu0 %89  ;;  %v1087_v50 = vpop.permute.xlu1 %74 }
  0x95   :  { %v1089_v51 = vpop.permute.xlu0 %79  ;;  %v65_v52 = vpop.permute.xlu1 %64 }
  0x99   :  { %v70_v55 = vpop.permute.xlu0 %69 }
  0xcc   :  { %v219_v53 = vpop.f32.mrf.mxu0 }
  0xcd   :  { %v220_v56 = vadd.f32 %v219_v53, %v65_v52 }
  0xce   :  { %v758_v54 = vpop.f32.mrf.mxu0 }
  0xcf   :  { %v273_v60 = vmax.f32 %v220_v56, 0.0  ;;  %v866_v56 = vld [vmem:[%s1172_s3 + $0x18] sm:$0xff]  }
  0xd0   :  { %v222_v57 = vpop.f32.mrf.mxu0 }
  0xd1   :  { %v223_v58 = vadd.f32 %v222_v57, %v70_v55  ;;  %v865_v55 = vld [vmem:[%s1172_s3 + $0x10] sm:$0xff]   ;;  %v867_v57 = vld [vmem:[%s1172_s3 + $0x20] sm:$0xff]  }
  0xd2   :  { %v759_v59 = vpop.f32.mrf.mxu0 }
  0xd3   :  { %v274_v61 = vmax.f32 %v223_v58, 0.0  ;;  %v868_v58 = vld [vmem:[%s1172_s3 + $0x28] sm:$0xff]   ;;  %v869_v59 = vld [vmem:[%s1172_s3 + $0x30] ss:$0 sps:$4 sm:$0x33]  }
  0xd4   :  { %v227_v62 = vpop.f32.mrf.mxu0 }
  0xd5   :  { %v1091_v63 = vpack.c.bf16 %v274_v61, %v273_v60  ;;  %v382_v60 = vpop.permute.xlu1 %381  ;;  %v372_v61 = vpop.permute.xlu0 %371 }
  0xd6   :  { %v762_v0 = vpop.f32.mrf.mxu0 }
  0xd8   :  { %v230_v2 = vpop.f32.mrf.mxu0 }
  0xda   :  { %v763_v3 = vpop.f32.mrf.mxu0 }
  0xdc   :  { %v235_v4 = vpop.f32.mrf.mxu0 }
  0xde   :  { %v766_v5 = vpop.f32.mrf.mxu0 }
  0xe0   :  { %v238_v6 = vpop.f32.mrf.mxu0 }
  0xe1   :  { %v239_v39 = vadd.f32 %v238_v6, %v90_v49 }
  0xe2   :  { %v767_v7 = vpop.f32.mrf.mxu0 }
  0xe4   :  { %v243_v8 = vpop.f32.mrf.mxu0 }
  0xe5   :  { %v244_v37 = vadd.f32 %v243_v8, %v95_v46 }
  0xe6   :  { %v770_v9 = vpop.f32.mrf.mxu0 }
  0xe8   :  { %v246_v10 = vpop.f32.mrf.mxu0 }
  0xe9   :  { %v247_v34 = vadd.f32 %v246_v10, %v100_v47  ;;  %v228_v47 = vadd.f32 %v227_v62, %v1087_v50  ;;  %v864_v50 = vld [vmem:[%s1172_s3 + $0x8] sm:$0xff]   ;;  %v377_v62 = vpop.permute.xlu1 %376 }
  0xea   :  { %v771_v11 = vpop.f32.mrf.mxu0 }
  0xeb   :  { %v280_v40 = vmax.f32 %v247_v34, 0.0  ;;  %v275_v49 = vmax.f32 %v228_v47, 0.0 }
  0xec   :  { %v251_v12 = vpop.f32.mrf.mxu0 }
  0xed   :  { %v252_v32 = vadd.f32 %v251_v12, %v105_v44  ;;  %v231_v44 = vadd.f32 %v230_v2, %v1089_v51  ;;  %v863_v51 = vld [vmem:[%s1172_s3] sm:$0xff]   ;;  %v367_v0 = vpop.permute.xlu1 %366 }
  0xee   :  { %v774_v13 = vpop.f32.mrf.mxu0 }
  0xef   :  { %v281_v38 = vmax.f32 %v252_v32, 0.0  ;;  %v276_v46 = vmax.f32 %v231_v44, 0.0 }
  0xf0   :  { %v254_v14 = vpop.f32.mrf.mxu0 }
  0xf1   :  { %v255_v28 = vadd.f32 %v254_v14, %v110_v45  ;;  %v278_v45 = vmax.f32 %v239_v39, 0.0  ;;  %v357_v3 = vpop.permute.xlu1 %356 }
  0xf2   :  { %v775_v15 = vpop.f32.mrf.mxu0 }
  0xf3   :  { %v282_v35 = vmax.f32 %v255_v28, 0.0 }
  0xf4   :  { %v259_v16 = vpop.f32.mrf.mxu0 }
  0xf5   :  { %v260_v25 = vadd.f32 %v259_v16, %v115_v43  ;;  %v279_v43 = vmax.f32 %v244_v37, 0.0  ;;  %v347_v5 = vpop.permute.xlu1 %346 }
  0xf6   :  { %v778_v17 = vpop.f32.mrf.mxu0 }
  0xf7   :  { %v283_v33 = vmax.f32 %v260_v25, 0.0  ;;  %v302_v52 = vpack.c.bf16 %v280_v40, %v279_v43 }
  0xf8   :  { %v262_v18 = vpop.f32.mrf.mxu0 }
  0xf9   :  { %v263_v22 = vadd.f32 %v262_v18, %v120_v42  ;;  %v236_v42 = vadd.f32 %v235_v4, %v85_v48  ;;  %v300_v48 = vpack.c.bf16 %v276_v46, %v275_v49  ;;  %v337_v7 = vpop.permute.xlu1 %336 }
  0xfa   :  { %v779_v19 = vpop.f32.mrf.mxu0 }
  0xfb   :  { %v284_v29 = vmax.f32 %v263_v22, 0.0  ;;  %v277_v53 = vmax.f32 %v236_v42, 0.0 }
  0xfc   :  { %v267_v20 = vpop.f32.mrf.mxu0 }
  0xfd   :  { %v268_v21 = vadd.f32 %v267_v20, %v125_v41  ;;  %v304_v36 = vpack.c.bf16 %v284_v29, %v283_v33  ;;  %v303_v41 = vpack.c.bf16 %v282_v35, %v281_v38  ;;  %v301_v54 = vpack.c.bf16 %v278_v45, %v277_v53  ;;  %v327_v12 = vpop.permute.xlu1 %326 }
  0xfe   :  { %v782_v23 = vpop.f32.mrf.mxu0 }
  0xff   :  { %v285_v24 = vmax.f32 %v268_v21, 0.0 }
 0x100   :  { %v270_v26 = vpop.f32.mrf.mxu0 }
 0x101   :  { %v305_v27 = vpack.c.bf16 %v285_v24, %v285_v24 }
 0x102   :  { %v783_v30 = vpop.f32.mrf.mxu0 }
 0x103   :  { %v441_v31 = vsel %vm439_vm2, %v305_v27, 0 }
 0x104   :  { %785 = vmatpush3.bf16.msra.mxu1 %v441_v31 }
 0x105   :  { %786 = vmatprep.subr.bf16.mxu1 %v893_v1 }
 0x108   :  { %787 = vmatpush3.bf16.msra.mxu1 %v304_v36 }
 0x109   :  { %788 = vmatprep.subr.bf16.mxu1 %v893_v1 }
 0x10c   :  { %789 = vmatpush3.bf16.msra.mxu1 %v303_v41 }
 0x10d   :  { %790 = vmatprep.subr.bf16.mxu1 %v893_v1 }
 0x110   :  { %791 = vmatpush3.bf16.msra.mxu1 %v302_v52 }
 0x111   :  { %792 = vmatprep.subr.bf16.mxu1 %v893_v1 }
 0x114   :  { %793 = vmatpush3.bf16.msra.mxu1 %v301_v54 }
 0x115   :  { %794 = vmatprep.subr.bf16.mxu1 %v893_v1 }
 0x118   :  { %795 = vmatpush3.bf16.msra.mxu1 %v300_v48 }
 0x119   :  { %796 = vmatprep.subr.bf16.mxu1 %v893_v1 }
 0x11c   :  { %797 = vmatpush3.bf16.msra.mxu1 %v1091_v63  ;;  %v362_v63 = vpop.permute.xlu0 %361 }
 0x11f   :  { %799 = vmatmul.mubr.msk.bf16.vlgmr.msra.gmra.mxu1 %vm417_vm3, %v863_v51 }
 0x120   :  { %802 = vmatprep.mubr.msk.bf16.mxu1 %vm894_vm1, %v893_v1  ;;  %v352_v2 = vpop.permute.xlu0 %351 }
 0x124   :  { %v342_v4 = vpop.permute.xlu0 %341 }
 0x127   :  { %803 = vmatmul.mubr.msk.bf16.gmra.mxu1 %vm417_vm3, %v864_v50 }
 0x128   :  { %806 = vmatprep.mubr.msk.bf16.mxu1 %vm894_vm1, %v893_v1  ;;  %v1143_v6 = vpop.permute.xlu0 %331 }
 0x12c   :  { %v322_v9 = vpop.permute.xlu0 %321 }
 0x12f   :  { %807 = vmatmul.mubr.msk.bf16.gmra.mxu1 %vm417_vm3, %v865_v55 }
 0x130   :  { %810 = vmatprep.mubr.msk.bf16.mxu1 %vm894_vm1, %v893_v1 }
 0x137   :  { %811 = vmatmul.mubr.msk.bf16.gmra.mxu1 %vm417_vm3, %v866_v56 }
 0x138   :  { %814 = vmatprep.mubr.msk.bf16.mxu1 %vm894_vm1, %v893_v1 }
 0x13f   :  { %815 = vmatmul.mubr.msk.bf16.gmra.mxu1 %vm417_vm3, %v867_v57 }
 0x140   :  { %818 = vmatprep.mubr.msk.bf16.mxu1 %vm894_vm1, %v893_v1 }
 0x147   :  { %819 = vmatmul.mubr.msk.bf16.gmra.mxu1 %vm417_vm3, %v868_v58 }
 0x148   :  { %822 = vmatprep.mubr.msk.bf16.mxu1 %vm894_vm1, %v893_v1 }
 0x14f   :  { %823 = vmatmul.mubr.msk.bf16.gmra.mxu1 %vm417_vm3, %v869_v59 }
 0x1df   :  { %v477_v8 = vpop.f32.mrf.mxu1 }
 0x1e0   :  { %v478_v11 = vadd.f32 %v477_v8, %v322_v9 }
 0x1e1   :  { %v800_v10 = vpop.f32.mrf.mxu1 }
 0x1e2   :  { %v531_v16 = vmax.f32 %v478_v11, 0.0 }
 0x1e3   :  { %v480_v13 = vpop.f32.mrf.mxu1 }
 0x1e4   :  { %v481_v14 = vadd.f32 %v480_v13, %v327_v12 }
 0x1e5   :  { %v801_v15 = vpop.f32.mrf.mxu1 }
 0x1e6   :  { %v532_v17 = vmax.f32 %v481_v14, 0.0  ;;  %v563_v14 = vpop.permute.xlu1 %562 }
 0x1e7   :  { %v485_v18 = vpop.f32.mrf.mxu1 }
 0x1e8   :  { %v1145_v19 = vpack.c.bf16 %v532_v17, %v531_v16 }
 0x1e9   :  { %v804_v20 = vpop.f32.mrf.mxu1 }
 0x1eb   :  { %v488_v21 = vpop.f32.mrf.mxu1 }
 0x1ed   :  { %v805_v22 = vpop.f32.mrf.mxu1 }
 0x1ee   :  { %v619_v22 = vld [vmem:[%s1176_s7] sm:$0x1] }
 0x1ef   :  { %v493_v23 = vpop.f32.mrf.mxu1 }
 0x1f1   :  { %v808_v24 = vpop.f32.mrf.mxu1 }
 0x1f3   :  { %v496_v25 = vpop.f32.mrf.mxu1 }
 0x1f4   :  { %v497_v58 = vadd.f32 %v496_v25, %v347_v5  ;;  %v870_v5 = vld [vmem:[%s1174_s5] sm:$0x1f]  }
 0x1f5   :  { %v809_v26 = vpop.f32.mrf.mxu1 }
 0x1f7   :  { %v501_v27 = vpop.f32.mrf.mxu1 }
 0x1f8   :  { %v502_v56 = vadd.f32 %v501_v27, %v352_v2 }
 0x1f9   :  { %v812_v28 = vpop.f32.mrf.mxu1 }
 0x1fb   :  { %v504_v29 = vpop.f32.mrf.mxu1 }
 0x1fc   :  { %v505_v51 = vadd.f32 %v504_v29, %v357_v3  ;;  %v486_v3 = vadd.f32 %v485_v18, %v1143_v6 }
 0x1fd   :  { %v813_v30 = vpop.f32.mrf.mxu1 }
 0x1fe   :  { %v538_v59 = vmax.f32 %v505_v51, 0.0  ;;  %v533_v11 = vmax.f32 %v486_v3, 0.0 }
 0x1ff   :  { %v509_v31 = vpop.f32.mrf.mxu1 }
 0x200   :  { %v510_v49 = vadd.f32 %v509_v31, %v362_v63  ;;  %v489_v63 = vadd.f32 %v488_v21, %v337_v7  ;;  %v558_v7 = vpop.permute.xlu0 %557 }
 0x201   :  { %v816_v32 = vpop.f32.mrf.mxu1 }
 0x202   :  { %v539_v57 = vmax.f32 %v510_v49, 0.0  ;;  %v534_v2 = vmax.f32 %v489_v63, 0.0 }
 0x203   :  { %v512_v33 = vpop.f32.mrf.mxu1 }
 0x204   :  { %v513_v47 = vadd.f32 %v512_v33, %v367_v0  ;;  %v536_v0 = vmax.f32 %v497_v58, 0.0 }
 0x205   :  { %v817_v34 = vpop.f32.mrf.mxu1 }
 0x206   :  { %v540_v50 = vmax.f32 %v513_v47, 0.0 }
 0x207   :  { %v517_v35 = vpop.f32.mrf.mxu1 }
 0x208   :  { %v518_v44 = vadd.f32 %v517_v35, %v372_v61  ;;  %v494_v61 = vadd.f32 %v493_v23, %v342_v4  ;;  %v547_v4 = vpack.c.bf16 %v534_v2, %v533_v11 }
 0x209   :  { %v820_v36 = vpop.f32.mrf.mxu1 }
 0x20a   :  { %v541_v48 = vmax.f32 %v518_v44, 0.0  ;;  %v535_v9 = vmax.f32 %v494_v61, 0.0 }
 0x20b   :  { %v520_v37 = vpop.f32.mrf.mxu1 }
 0x20c   :  { %v521_v41 = vadd.f32 %v520_v37, %v377_v62  ;;  %v537_v62 = vmax.f32 %v502_v56, 0.0  ;;  %v548_v10 = vpack.c.bf16 %v536_v0, %v535_v9 }
 0x20d   :  { %v821_v38 = vpop.f32.mrf.mxu1 }
 0x20e   :  { %v542_v53 = vmax.f32 %v521_v41, 0.0  ;;  %v549_v8 = vpack.c.bf16 %v538_v59, %v537_v62 }
 0x20f   :  { %v525_v39 = vpop.f32.mrf.mxu1 }
 0x210   :  { %v526_v40 = vadd.f32 %v525_v39, %v382_v60  ;;  %v551_v55 = vpack.c.bf16 %v542_v53, %v541_v48  ;;  %v550_v60 = vpack.c.bf16 %v540_v50, %v539_v57 }
 0x211   :  { %v824_v42 = vpop.f32.mrf.mxu1 }
 0x212   :  { %v543_v43 = vmax.f32 %v526_v40, 0.0 }
 0x213   :  { %v528_v45 = vpop.f32.mrf.mxu1 }
 0x214   :  { %v552_v52 = vpack.c.bf16 %v543_v43, %v543_v43 }
 0x215   :  { %v825_v46 = vpop.f32.mrf.mxu1 }
 0x216   :  { %v574_v54 = vsel %vm439_vm2, %v552_v52, 0 }
 0x217   :  { %827 = vmatpush3.bf16.msra.mxu0 %v574_v54 }
 0x218   :  { %828 = vmatprep.subr.bf16.mxu0 %v893_v1 }
 0x21b   :  { %829 = vmatpush3.bf16.msra.mxu0 %v551_v55 }
 0x21c   :  { %830 = vmatprep.subr.bf16.mxu0 %v893_v1 }
 0x21f   :  { %831 = vmatpush3.bf16.msra.mxu0 %v550_v60 }
 0x220   :  { %832 = vmatprep.subr.bf16.mxu0 %v893_v1 }
 0x223   :  { %833 = vmatpush3.bf16.msra.mxu0 %v549_v8 }
 0x224   :  { %834 = vmatprep.subr.bf16.mxu0 %v893_v1 }
 0x227   :  { %835 = vmatpush3.bf16.msra.mxu0 %v548_v10 }
 0x228   :  { %836 = vmatprep.subr.bf16.mxu0 %v893_v1 }
 0x22b   :  { %837 = vmatpush3.bf16.msra.mxu0 %v547_v4 }
 0x22c   :  { %838 = vmatprep.subr.bf16.mxu0 %v893_v1 }
 0x22f   :  { %839 = vmatpush3.bf16.msra.mxu0 %v1145_v19 }
 0x230   :  { %844 = vmatprep.subr.bf16.mxu0 %v893_v1 }
 0x232   :  { %841 = vmatmul.mubr.msk.bf16.vlgmr.msra.gmra.mxu0 %vm417_vm3, %v870_v5 }
 0x233   :  { %846 = vmatprep.mubr.msk.bf16.mxu0 %vm894_vm1, %v893_v1  ;;  %v625_v1 = vpop.permute.xlu0 %624 }
 0x2f2   :  { %v610_v6 = vpop.f32.mrf.mxu0 }
 0x2f3   :  { %v611_v13 = vadd.f32 %v610_v6, %v558_v7 }
 0x2f4   :  { %v842_v12 = vpop.f32.mrf.mxu0 }
 0x2f5   :  { %v617_v18 = vmax.f32 %v611_v13, 0.0 }
 0x2f6   :  { %v613_v15 = vpop.f32.mrf.mxu0 }
 0x2f7   :  { %v614_v16 = vadd.f32 %v613_v15, %v563_v14 }
 0x2f8   :  { %v843_v17 = vpop.f32.mrf.mxu0 }
 0x2f9   :  { %v618_v20 = vmax.f32 %v614_v16, 0.0 }
 0x2fb   :  { %v620_v21 = vpack.c.bf16 %v618_v20, %v617_v18 }
 0x2fd   :  { %v633_v19 = vsel %vm631_vm4, %v620_v21, 0 }
 0x2fe   :  { %845 = vmatpush3.bf16.msra.mxu0 %v633_v19 }
 0x301   :  { %847 = vmatmul.mubr.msk.bf16.vlgmr.msra.gmra.mxu0 %vm627_vm5, %v619_v22 }
 0x3c1   :  { %v669_v23 = vpop.f32.mrf.mxu0 }
 0x3c2   :  { %v670_v24 = vadd.f32 %v669_v23, %v625_v1 }
 0x3c3   :  { %v848_v25 = vpop.f32.mrf.mxu0 }
 0x3c4   :  { %676 = vst.msk [vmem:[#allocation2] sm:$0x3] %vm675_vm6, %v670_v24 }
 0x3c5   :  { %v672_v26 = vpop.f32.mrf.mxu0 }
 0x3c6   :  { %882 = shalt.err (!%p879_p4)
}
 0x3c7   :  { %686 = dma.vmem_to_hbm [thread:$0]  %s684_s27, 32, %s1178_s9, [#allocation3]   ;;  %v849_v27 = vpop.f32.mrf.mxu0 }
 0x3c8   :  { %891 = dma.done.wait [#allocation3], 32  }
 0x3c9   :  { %892 = vsyncadd [#allocation3], 4294967264 }
 0x3ca   :  { %690 = vsyncpa [#allocation3], 1 }

</bundles_post_ra>
